<compile_context>
chip_gen: v7x
topology: tpu7x:2x2x1
jax: 0.10.0
libtpu: 0.0.40
codegen_flags: <defaults>
</compile_context>

<pallas_src>
import jax
import jax.numpy as jnp
from jax.experimental import pallas as pl
from jax.experimental.pallas import tpu as pltpu


def _mm(w, x):
    """(out, k) @ (k, Bt) -> (out, Bt).

    k == 1 degenerates to an outer product; do it as a VPU broadcast multiply
    instead of an MXU matmul with a size-1 contraction.
    """
    if w.shape[-1] == 1:
        return w * x
    return jnp.dot(w, x, preferred_element_type=jnp.float32)


def critic_kernel(s_ref, a_ref, w1s_ref, w1a_ref, b1_ref,
                  w2_ref, b2_ref, w3_ref, b3_ref, o_ref):
    """Fused 3-layer MLP, transposed layout: activations are (features, Bt)."""
    h1 = _mm(w1s_ref[...], s_ref[...]) + _mm(w1a_ref[...], a_ref[...]) + b1_ref[...]
    h1 = jnp.maximum(h1, 0.0)                                       # (16, Bt)
    h2 = jnp.maximum(_mm(w2_ref[...], h1) + b2_ref[...], 0.0)       # (16, Bt)
    q = _mm(w3_ref[...], h2) + b3_ref[...]                          # (1, Bt)
    o_ref[...] = q.astype(o_ref.dtype)


def _round_up(x, m):
    return (x + m - 1) // m * m


def critic_forward(state, action, params, *, max_tile_b=1024):
    """state: (B, state_dim), action: (B, action_dim) -> q: (B, 1)."""
    w1s, w1a, b1, w2, b2, w3, b3 = params
    batch, state_dim = state.shape
    action_dim = action.shape[1]

    # Batch on lanes: transpose and zero-pad the batch axis to a tile multiple.
    tile_b = min(max_tile_b, _round_up(batch, 128))
    b_pad = _round_up(batch, tile_b)
    sT = jnp.pad(state.astype(jnp.float32).T, ((0, 0), (0, b_pad - batch)))
    aT = jnp.pad(action.astype(jnp.float32).T, ((0, 0), (0, b_pad - batch)))

    grid = (b_pad // tile_b,)
    batch_spec = lambda rows: pl.BlockSpec((rows, tile_b), lambda i: (0, i))
    resident = lambda a: pl.BlockSpec(a.shape, lambda i: (0,) * a.ndim)

    out = pl.pallas_call(
        critic_kernel,
        out_shape=jax.ShapeDtypeStruct((1, b_pad), jnp.float32),
        grid=grid,
        in_specs=[batch_spec(state_dim), batch_spec(action_dim),
                  resident(w1s), resident(w1a), resident(b1),
                  resident(w2), resident(b2), resident(w3), resident(b3)],
        out_specs=batch_spec(1),
        compiler_params=pltpu.CompilerParams(
            dimension_semantics=("parallel",)),
    )(sT, aT, w1s, w1a, b1, w2, b2, w3, b3)

    return out[0, :batch].reshape(batch, 1)


def init_critic_params(key, state_dim, action_dim):
    """Deterministic params, PyTorch-Linear-style uniform init.

    Weights are stored (out_features, in_features) — the layout the transposed
    kernel consumes directly — and biases are (out_features, 1).
    """
    def uniform(k, shape, bound):
        return jax.random.uniform(k, shape, jnp.float32, -bound, bound)

    k1s, k1a, kb1, k2, kb2, k3, kb3 = jax.random.split(key, 7)
    bound1 = 1.0 / float(state_dim + action_dim) ** 0.5
    bound2 = 1.0 / 16.0 ** 0.5
    bound3 = 1.0 / 16.0 ** 0.5
    w1s = uniform(k1s, (16, state_dim), bound1)
    w1a = uniform(k1a, (16, action_dim), bound1)
    b1 = uniform(kb1, (16, 1), bound1)
    w2 = uniform(k2, (16, 16), bound2)
    b2 = uniform(kb2, (16, 1), bound2)
    w3 = uniform(k3, (1, 16), bound3)
    b3 = uniform(kb3, (1, 1), bound3)
    return (w1s, w1a, b1, w2, b2, w3, b3)


def critic_reference(state, action, params):
    """Pure-JAX reference matching the PyTorch forward (concat -> fc1..fc3)."""
    w1s, w1a, b1, w2, b2, w3, b3 = params
    x = jnp.concatenate([state, action], axis=1).astype(jnp.float32)
    w1 = jnp.concatenate([w1s, w1a], axis=1)          # (16, state+action)
    h = jnp.maximum(x @ w1.T + b1.T, 0.0)
    h = jnp.maximum(h @ w2.T + b2.T, 0.0)
    return h @ w3.T + b3.T                            # (B, 1)


if __name__ == "__main__":
    batch = 8
    state_dim = 3
    action_dim = 1

    key = jax.random.PRNGKey(0)
    k_state, k_action, k_params = jax.random.split(key, 3)

    state = jax.random.normal(k_state, (batch, state_dim), jnp.float32)
    action = jax.random.normal(k_action, (batch, action_dim), jnp.float32)
    params = init_critic_params(k_params, state_dim, action_dim)

    q = critic_forward(state, action, params)
    q = jax.block_until_ready(q)

    q_ref = critic_reference(state, action, params)
    assert q.shape == (batch, 1), q.shape
    assert jnp.allclose(q, q_ref, atol=1e-5, rtol=1e-5), (q, q_ref)

    print("KERNEL_OK")
</pallas_src>

<mosaic_0001>
module attributes {stable_mosaic.version = 11 : i64} {
  func.func @critic_kernel(%arg0: i32, %arg1: memref<3x128xf32, #tpu.memory_space<vmem>>, %arg2: memref<1x128xf32, #tpu.memory_space<vmem>>, %arg3: memref<16x3xf32, #tpu.memory_space<vmem>>, %arg4: memref<16x1xf32, #tpu.memory_space<vmem>>, %arg5: memref<16x1xf32, #tpu.memory_space<vmem>>, %arg6: memref<16x16xf32, #tpu.memory_space<vmem>>, %arg7: memref<16x1xf32, #tpu.memory_space<vmem>>, %arg8: memref<1x16xf32, #tpu.memory_space<vmem>>, %arg9: memref<1x1xf32, #tpu.memory_space<vmem>>, %arg10: memref<1x128xf32, #tpu.memory_space<vmem>>) attributes {dimension_semantics = [#tpu.dimension_semantics<parallel>], iteration_bounds = array<i64: 1>, scalar_prefetch = 0 : i64, scratch_operands = 0 : i64, tpu.core_type = #tpu.core_type<tc>, window_params = [{transform_indices = @transform_0, window_bounds = array<i64: 3, 128>}, {transform_indices = @transform_1, window_bounds = array<i64: 1, 128>}, {pipeline_mode = #tpu.pipeline_mode<synchronous>, transform_indices = @transform_2, window_bounds = array<i64: 16, 3>}, {pipeline_mode = #tpu.pipeline_mode<synchronous>, transform_indices = @transform_3, window_bounds = array<i64: 16, 1>}, {pipeline_mode = #tpu.pipeline_mode<synchronous>, transform_indices = @transform_4, window_bounds = array<i64: 16, 1>}, {pipeline_mode = #tpu.pipeline_mode<synchronous>, transform_indices = @transform_5, window_bounds = array<i64: 16, 16>}, {pipeline_mode = #tpu.pipeline_mode<synchronous>, transform_indices = @transform_6, window_bounds = array<i64: 16, 1>}, {pipeline_mode = #tpu.pipeline_mode<synchronous>, transform_indices = @transform_7, window_bounds = array<i64: 1, 16>}, {pipeline_mode = #tpu.pipeline_mode<synchronous>, transform_indices = @transform_8, window_bounds = array<i64: 1, 1>}, {transform_indices = @transform_9, window_bounds = array<i64: 1, 128>}]} {
    %c0 = arith.constant 0 : index
    %c0_0 = arith.constant 0 : index
    %0 = vector.load %arg3[%c0, %c0_0] : memref<16x3xf32, #tpu.memory_space<vmem>>, vector<16x3xf32>
    %c0_1 = arith.constant 0 : index
    %c0_2 = arith.constant 0 : index
    %1 = vector.load %arg1[%c0_1, %c0_2] : memref<3x128xf32, #tpu.memory_space<vmem>>, vector<3x128xf32>
    %cst = arith.constant dense<0.000000e+00> : vector<16x128xf32>
    %2 = tpu.matmul %0, %1, %cst {dimension_numbers = #tpu.dot_dimension_numbers<[1], [0], [0], [1], [0, 0, 1, 1], [], []>} : vector<16x3xf32>, vector<3x128xf32>, vector<16x128xf32> -> vector<16x128xf32>
    %c0_3 = arith.constant 0 : index
    %c0_4 = arith.constant 0 : index
    %3 = vector.load %arg4[%c0_3, %c0_4] : memref<16x1xf32, #tpu.memory_space<vmem>>, vector<16x1xf32>
    %c0_5 = arith.constant 0 : index
    %c0_6 = arith.constant 0 : index
    %4 = vector.load %arg2[%c0_5, %c0_6] : memref<1x128xf32, #tpu.memory_space<vmem>>, vector<1x128xf32>
    %5 = vector.broadcast %3 : vector<16x1xf32> to vector<16x128xf32>
    %6 = vector.broadcast %4 : vector<1x128xf32> to vector<16x128xf32>
    %7 = arith.mulf %5, %6 : vector<16x128xf32>
    %8 = arith.addf %2, %7 : vector<16x128xf32>
    %c0_7 = arith.constant 0 : index
    %c0_8 = arith.constant 0 : index
    %9 = vector.load %arg5[%c0_7, %c0_8] : memref<16x1xf32, #tpu.memory_space<vmem>>, vector<16x1xf32>
    %10 = vector.broadcast %9 : vector<16x1xf32> to vector<16x128xf32>
    %11 = arith.addf %8, %10 : vector<16x128xf32>
    %cst_9 = arith.constant 0.000000e+00 : f32
    %12 = vector.broadcast %cst_9 : f32 to vector<16x128xf32>
    %13 = arith.maximumf %11, %12 : vector<16x128xf32>
    %c0_10 = arith.constant 0 : index
    %c0_11 = arith.constant 0 : index
    %14 = vector.load %arg6[%c0_10, %c0_11] : memref<16x16xf32, #tpu.memory_space<vmem>>, vector<16x16xf32>
    %cst_12 = arith.constant dense<0.000000e+00> : vector<16x128xf32>
    %15 = tpu.matmul %14, %13, %cst_12 {dimension_numbers = #tpu.dot_dimension_numbers<[1], [0], [0], [1], [0, 0, 1, 1], [], []>} : vector<16x16xf32>, vector<16x128xf32>, vector<16x128xf32> -> vector<16x128xf32>
    %c0_13 = arith.constant 0 : index
    %c0_14 = arith.constant 0 : index
    %16 = vector.load %arg7[%c0_13, %c0_14] : memref<16x1xf32, #tpu.memory_space<vmem>>, vector<16x1xf32>
    %17 = vector.broadcast %16 : vector<16x1xf32> to vector<16x128xf32>
    %18 = arith.addf %15, %17 : vector<16x128xf32>
    %cst_15 = arith.constant 0.000000e+00 : f32
    %19 = vector.broadcast %cst_15 : f32 to vector<16x128xf32>
    %20 = arith.maximumf %18, %19 : vector<16x128xf32>
    %c0_16 = arith.constant 0 : index
    %c0_17 = arith.constant 0 : index
    %21 = vector.load %arg8[%c0_16, %c0_17] : memref<1x16xf32, #tpu.memory_space<vmem>>, vector<1x16xf32>
    %cst_18 = arith.constant dense<0.000000e+00> : vector<1x128xf32>
    %22 = tpu.matmul %21, %20, %cst_18 {dimension_numbers = #tpu.dot_dimension_numbers<[1], [0], [0], [1], [0, 0, 1, 1], [], []>} : vector<1x16xf32>, vector<16x128xf32>, vector<1x128xf32> -> vector<1x128xf32>
    %c0_19 = arith.constant 0 : index
    %c0_20 = arith.constant 0 : index
    %23 = vector.load %arg9[%c0_19, %c0_20] : memref<1x1xf32, #tpu.memory_space<vmem>>, vector<1x1xf32>
    %24 = vector.broadcast %23 : vector<1x1xf32> to vector<1x128xf32>
    %25 = arith.addf %22, %24 : vector<1x128xf32>
    %c0_21 = arith.constant 0 : index
    %c0_22 = arith.constant 0 : index
    %26 = vector.load %arg10[%c0_21, %c0_22] : memref<1x128xf32, #tpu.memory_space<vmem>>, vector<1x128xf32>
    tpu.vector_store %arg10[%c0_21, %c0_22], %25 {strides = array<i32>} : memref<1x128xf32, #tpu.memory_space<vmem>>, vector<1x128xf32>,
    return
  }
  func.func @transform_0(%arg0: i32) -> (i32, i32) {
    %c0_i32 = arith.constant 0 : i32
    %c0_i32_0 = arith.constant 0 : i32
    return %c0_i32, %arg0 : i32, i32
  }
  func.func @transform_1(%arg0: i32) -> (i32, i32) {
    %c0_i32 = arith.constant 0 : i32
    %c0_i32_0 = arith.constant 0 : i32
    return %c0_i32, %arg0 : i32, i32
  }
  func.func @transform_2(%arg0: i32) -> (i32, i32) {
    %c0_i32 = arith.constant 0 : i32
    %c0_i32_0 = arith.constant 0 : i32
    %c0_i32_1 = arith.constant 0 : i32
    return %c0_i32, %c0_i32_0 : i32, i32
  }
  func.func @transform_3(%arg0: i32) -> (i32, i32) {
    %c0_i32 = arith.constant 0 : i32
    %c0_i32_0 = arith.constant 0 : i32
    %c0_i32_1 = arith.constant 0 : i32
    return %c0_i32, %c0_i32_0 : i32, i32
  }
  func.func @transform_4(%arg0: i32) -> (i32, i32) {
    %c0_i32 = arith.constant 0 : i32
    %c0_i32_0 = arith.constant 0 : i32
    %c0_i32_1 = arith.constant 0 : i32
    return %c0_i32, %c0_i32_0 : i32, i32
  }
  func.func @transform_5(%arg0: i32) -> (i32, i32) {
    %c0_i32 = arith.constant 0 : i32
    %c0_i32_0 = arith.constant 0 : i32
    %c0_i32_1 = arith.constant 0 : i32
    return %c0_i32, %c0_i32_0 : i32, i32
  }
  func.func @transform_6(%arg0: i32) -> (i32, i32) {
    %c0_i32 = arith.constant 0 : i32
    %c0_i32_0 = arith.constant 0 : i32
    %c0_i32_1 = arith.constant 0 : i32
    return %c0_i32, %c0_i32_0 : i32, i32
  }
  func.func @transform_7(%arg0: i32) -> (i32, i32) {
    %c0_i32 = arith.constant 0 : i32
    %c0_i32_0 = arith.constant 0 : i32
    %c0_i32_1 = arith.constant 0 : i32
    return %c0_i32, %c0_i32_0 : i32, i32
  }
  func.func @transform_8(%arg0: i32) -> (i32, i32) {
    %c0_i32 = arith.constant 0 : i32
    %c0_i32_0 = arith.constant 0 : i32
    %c0_i32_1 = arith.constant 0 : i32
    return %c0_i32, %c0_i32_0 : i32, i32
  }
  func.func @transform_9(%arg0: i32) -> (i32, i32) {
    %c0_i32 = arith.constant 0 : i32
    %c0_i32_0 = arith.constant 0 : i32
    return %c0_i32, %arg0 : i32, i32
  }
}

</mosaic_0001>

<bundles_post_ra>
// kernel: tpu_custom_call.1
= control target key start
LH: loop header
LB: loop body
LE: loop exit
PB: predicated region body
PF: predicated region fallthrough
CT: control target
= control target key end

     0   :  { %s544_s0 = inlined_call_operand.vmem [shape: f32[3,128], index: 0, kind: input, shape index: {}]   ;;  %s545_s1 = inlined_call_operand.vmem [shape: f32[1,128], index: 1, kind: input, shape index: {}]   ;;  %s546_s2 = inlined_call_operand.vmem [shape: f32[16,3], index: 2, kind: input, shape index: {}]   ;;  %s547_s3 = inlined_call_operand.vmem [shape: f32[16,1], index: 3, kind: input, shape index: {}]   ;;  %s548_s4 = inlined_call_operand.vmem [shape: f32[16,1], index: 4, kind: input, shape index: {}]   ;;  %s549_s5 = inlined_call_operand.vmem [shape: f32[16,16], index: 5, kind: input, shape index: {}]   ;;  %s550_s6 = inlined_call_operand.vmem [shape: f32[16,1], index: 6, kind: input, shape index: {}]   ;;  %s551_s7 = inlined_call_operand.vmem [shape: f32[1,16], index: 7, kind: input, shape index: {}]   ;;  %s552_s8 = inlined_call_operand.<no memory space> [shape: f32[1,1], index: 8, kind: input, shape index: {}]   ;;  %s553_s9 = inlined_call_operand.hbm [shape: f32[1,128], index: 9, kind: output, shape index: {}]  }
   0x1   :  { %v14_v0 = vstv %s552_s8 }
   0x2   :  { %15 = vst [vmem:[#allocation2] sm:$0x1] %v14_v0 }
   0x3   :  { %v37_v1 = vld [vmem:[%s544_s0] sm:$0x7]  ;;  %vm66_vm0 = vcmask 1042432   ;;  %vm59_vm1 = vcmask 23552   ;;  %v36_v3 = vld [vmem:[%s546_s2 + $0x8] sm:$0xff]  ;;  %v432_v5 = vmov 0  }
   0x4   :  { %v35_v2 = vld [vmem:[%s546_s2] sm:$0xff]  ;;  %375 = vmatprep.subr.msk.mxu0 %vm66_vm0, %v37_v1  ;;  %406 = vset.pattern.permute.xlu0 %v432_v5 }
   0x5   :  { %377 = vmatprep.mubr.msk.f32.mxu0 %vm59_vm1, %v35_v2  ;;  %v38_v4 = vld [vmem:[%s547_s3] sm:$0xff]  ;;  %376 = vmatpush3.msk.msra.mxu0 %vm66_vm0, %v37_v1 }
   0x6   :  { %v145_v6 = vld [vmem:[%s548_s4] sm:$0xff]  ;;  %378 = vmatmul.mubr.msk.f32.vlgmr.msra.gmra.mrb[0].mxu0 %vm59_vm1, %v36_v3  ;;  %43 = vperm.xlu0 %406, %v38_v4  }
   0x7   :  { %16 = vsyncpa [#allocation4], 0  ;;  %v39_v7 = vld [vmem:[%s547_s3 + $0x8] sm:$0xff]  ;;  %407 = vset.pattern.permute.xlu1 %v432_v5  ;;  %v163_v9 = vld [vmem:[%s550_s6] sm:$0xff]  ;;  %vm175_vm2 = vcmask 130048   ;;  %v433_v30 = vmov 0.0|0.0   ;;  %v266_v42 = vlaneseq }
   0x8   :  { %149 = vperm.xlu1 %407, %v145_v6   ;;  %v146_v8 = vld [vmem:[%s548_s4 + $0x8] sm:$0xff]  ;;  %v161_v12 = vld [vmem:[%s549_s5] sm:$0xff]  ;;  %398 = vmatprep.subr.bf16.mxu0 %v433_v30  ;;  %vm434_vm3 = vmmov 0   ;;  %v435_v31 = vmov 0.0  }
   0x9   :  { %v164_v10 = vld [vmem:[%s550_s6 + $0x8] sm:$0xff]  ;;  %v260_v11 = vld [vmem:[#allocation2] sm:$0x1]  ;;  %384 = vmatprep.mubr.msk.f32.mxu1 %vm175_vm2, %v161_v12  ;;  %391 = vmatprep.mubr.msk.f32.mxu0 %vm434_vm3, %v435_v31  ;;  %v267_v43 = vshrl.u32 %v266_v42, 7 }
   0xa   :  { %48 = vperm.xlu0 %406, %v39_v7   ;;  %v358_v14 = vld [vmem:[%s545_s1] ss:$0 sm:$0xff]  ;;  %v162_v29 = vld [vmem:[%s549_s5 + $0x8] sm:$0xff]  ;;  %s436_s5 = smov [#allocation3]  }
   0xb   :  { %v259_v41 = vld [vmem:[%s551_s7] sm:$0x1]  ;;  %v268_v44 = vsub.s32 0, %v267_v43  ;;  %s350_s30 = sshll.u32 %s436_s5, 4  ;;  %s351_s30 = int_to_ptr.vmem [resolvable:$true] %s350_s30 }
   0xc   :  { %154 = vperm.xlu1 %407, %v146_v8   ;;  %s408_s10 = scalar_lea.vmem %s351_s30, 16  ;;  %s412_s11 = scalar_lea.vmem %s351_s30, 32 }
   0xd   :  { %p409_p0 = scmp.ne.s32.totalorder %s351_s30, %s408_s10  ;;  %p413_p1 = scmp.lt.s32.totalorder %s351_s30, %s351_s30 }
   0xe   :  { %167 = vperm.xlu0 %406, %v163_v9   ;;  %p414_p2 = scmp.lt.s32.totalorder %s412_s11, %s408_s10 }
  0x10   :  { %172 = vperm.xlu1 %407, %v164_v10   ;;  %p415_p3 = por %p414_p2, %p413_p1 }
  0x12   :  { %263 = vperm.xlu0 %406, %v260_v11   ;;  %p416_p4 = pnand %p415_p3, %p409_p0 }
  0x85   :  { %v44_v13 = vpop.permute.xlu0 %43 }
  0x86   :  { %v57_v18 = vmul.f32 %v358_v14, %v44_v13 }
  0x87   :  { %v150_v15 = vpop.permute.xlu1 %149 }
  0x89   :  { %v49_v16 = vpop.permute.xlu0 %48 }
  0x8a   :  { %v58_v17 = vmul.f32 %v358_v14, %v49_v16 }
  0x8b   :  { %v155_v22 = vpop.permute.xlu1 %154 }
  0x8d   :  { %v168_v34 = vpop.permute.xlu0 %167 }
  0x8f   :  { %v173_v32 = vpop.permute.xlu1 %172 }
  0x91   :  { %v264_v45 = vpop.permute.xlu0 %263 }
  0x92   :  { %v269_v46 = vrot.slane %v264_v45, %v268_v44 }
  0xd9   :  { %v379_v19 = vpop.f32.mrb[0].mxu0 }
  0xda   :  { %v142_v20 = vadd.f32 %v379_v19, %v58_v17  ;;  %v136_v21 = vpop.f32.mrb[1].mxu0 }
  0xdb   :  { %v137_v23 = vadd.f32 %v136_v21, %v57_v18 }
  0xdc   :  { %v158_v24 = vadd.f32 %v155_v22, %v142_v20 }
  0xdd   :  { %v157_v25 = vadd.f32 %v150_v15, %v137_v23 }
  0xde   :  { %v160_v26 = vmax.f32 %v158_v24, 0.0 }
  0xdf   :  { %v159_v27 = vmax.f32 %v157_v25, 0.0 }
  0xe1   :  { %v394_v28 = vpack.c.bf16 %v160_v26, %v159_v27 }
  0xe3   :  { %395 = vmatprep.subr.bf16.mxu1 %v394_v28 }
  0xe4   :  { %397 = vmatpush3.bf16.msra.mxu1 %v394_v28 }
  0xe7   :  { %385 = vmatmul.mubr.msk.f32.vlgmr.msra.gmra.mrb[0].mxu1 %vm175_vm2, %v162_v29 }
 0x1ba   :  { %v386_v33 = vpop.f32.mrb[0].mxu1 }
 0x1bb   :  { %v254_v35 = vadd.f32 %v386_v33, %v173_v32  ;;  %v248_v36 = vpop.f32.mrb[1].mxu1 }
 0x1bc   :  { %v249_v37 = vadd.f32 %v248_v36, %v168_v34 }
 0x1bd   :  { %v258_v38 = vmax.f32 %v254_v35, 0.0 }
 0x1be   :  { %v257_v39 = vmax.f32 %v249_v37, 0.0 }
 0x1c0   :  { %v399_v40 = vpack.c.bf16 %v258_v38, %v257_v39 }
 0x1c2   :  { %400 = vmatpush3.bf16.msra.mxu0 %v399_v40 }
 0x1c5   :  { %392 = vmatmul.mubr.msk.f32.vlgmr.msra.gmra.mrb[2].mxu0 %vm175_vm2, %v259_v41 }
 0x298   :  { %v339_v47 = vpop.f32.mrb[2].mxu0 }
 0x299   :  { %v340_v48 = vadd.f32 %v339_v47, %v269_v46  ;;  %v393_v49 = vpop.f32.mrb[3].mxu0 }
 0x29b   :  { %343 = vst [vmem:[#allocation3] sm:$0x1] %v340_v48 }
 0x29c   :  { %419 = shalt.err (!%p416_p4)
}
 0x29d   :  { %s420_s13 = scalar_lea.hbm %s553_s9, 16 }
 0x29e   :  { %p421_p5 = scmp.ne.s32.totalorder %s553_s9, %s420_s13  ;;  %p424_p6 = scmp.lt.u32.totalorder %s420_s13, %s553_s9 }
 0x2a0   :  { %p426_p7 = pnand %p424_p6, %p421_p5 }
 0x2a2   :  { %429 = shalt.err (!%p426_p7)
}
 0x2a3   :  { %353 = dma.vmem_to_hbm [thread:$0]  %s351_s30, 16, %s553_s9, [#allocation4]  }
 0x2a4   :  { %430 = dma.done.wait [#allocation4], 16  }
 0x2a5   :  { %431 = vsyncadd [#allocation4], 4294967280 }
 0x2a6   :  { %357 = vsyncpa [#allocation4], 1 }

</bundles_post_ra>
